<compile_context>
chip_gen: v6e
topology: v6e:2x2x1
jax: 0.10.0
libtpu: 0.0.40
codegen_flags: <defaults>
</compile_context>

<pallas_src>
import functools

import jax
import jax.numpy as jnp
from jax.experimental import pallas as pl
from jax.experimental.pallas import tpu as pltpu


def _channel_attention_kernel(x_ref, w1t_ref, b1_ref, w2t_ref, b2_ref, o_ref,
                              *, inv_hw, hw_valid, hw_padded):
    # x_ref: (Bt, C, HWp) block in the input dtype.
    xv = x_ref[...]
    xf = xv.astype(jnp.float32)

    # --- global pools over the spatial (lane) axis ------------------------
    if hw_valid != hw_padded:
        # Padded lanes hold zeros (correct for the sum) but must not win the max.
        lane = jax.lax.broadcasted_iota(jnp.int32, (1, 1, hw_padded), 2)
        max_src = jnp.where(lane < hw_valid, xf, -jnp.inf)
    else:
        max_src = xf

    avg_p = jnp.sum(xf, axis=-1) * inv_hw          # (Bt, C) f32
    max_p = jnp.max(max_src, axis=-1)              # (Bt, C) f32

    # --- shared MLP, both pools fused into a single matmul pair -----------
    p = jnp.concatenate([avg_p, max_p], axis=0)    # (2*Bt, C)
    h = jnp.dot(p, w1t_ref[...], preferred_element_type=jnp.float32) + b1_ref[...]
    h = jnp.maximum(h, 0.0)                        # ReLU
    y = jnp.dot(h, w2t_ref[...], preferred_element_type=jnp.float32) + b2_ref[...]

    bt = xv.shape[0]
    att = jax.nn.sigmoid(y[:bt] + y[bt:])          # (Bt, C) f32

    # --- scale the feature map (broadcast over spatial) --------------------
    o_ref[...] = xv * att.astype(xv.dtype)[:, :, None]


def _choose_batch_tile(B, C, HWp, itemsize, target_bytes=2 * 1024 * 1024):
    """Pick Bt (batch elements per grid step) so the x tile is ~target_bytes,
    while keeping >= 2 grid steps when B >= 2 (v7x has 2 TensorCores)."""
    per_batch = C * HWp * itemsize
    bt_budget = max(1, target_bytes // per_batch)
    min_groups = 2 if B >= 2 else 1
    num_groups = max(min_groups, -(-B // bt_budget))   # ceil
    bt = -(-B // num_groups)                           # ceil
    num_groups = -(-B // bt)
    return bt, num_groups


def channel_attention(x_nchw, w1, b1, w2, b2):
    """x_nchw: (B, C, H, W). Weights follow nn.Linear layout:
       w1: (C//r, C), b1: (C//r,), w2: (C, C//r), b2: (C,)."""
    B, C, H, W = x_nchw.shape
    HW = H * W
    Cr = w1.shape[0]
    dtype = x_nchw.dtype
    itemsize = jnp.dtype(dtype).itemsize

    # Lane-dense spatial axis (multiple of 128) + batch tiling.
    HWp = ((HW + 127) // 128) * 128
    Bt, num_groups = _choose_batch_tile(B, C, HWp, itemsize)
    Bp = Bt * num_groups

    x = x_nchw.reshape(B, C, HW)
    if Bp != B or HWp != HW:
        x = jnp.pad(x, ((0, Bp - B), (0, 0), (0, HWp - HW)))

    # Pre-transpose weights so the kernel does row-major (rows, C) matmuls.
    w1t = jnp.asarray(w1, jnp.float32).T            # (C, Cr)
    w2t = jnp.asarray(w2, jnp.float32).T            # (Cr, C)
    b1r = jnp.asarray(b1, jnp.float32).reshape(1, Cr)
    b2r = jnp.asarray(b2, jnp.float32).reshape(1, C)

    kernel = functools.partial(_channel_attention_kernel,
                               inv_hw=1.0 / HW, hw_valid=HW, hw_padded=HWp)

    # VMEM budget: 2x double-buffered input + output tiles plus slack.
    tile_bytes = Bt * C * HWp * itemsize
    vmem_limit = int(min(max(4 * tile_bytes + (4 << 20), 16 << 20), 48 << 20))

    out = pl.pallas_call(
        kernel,
        out_shape=jax.ShapeDtypeStruct((Bp, C, HWp), dtype),
        grid_spec=pltpu.PrefetchScalarGridSpec(
            num_scalar_prefetch=0,
            grid=(num_groups,),
            in_specs=[
                pl.BlockSpec((Bt, C, HWp), lambda g: (g, 0, 0)),  # x tile
                pl.BlockSpec((C, Cr), lambda g: (0, 0)),          # W1^T (full)
                pl.BlockSpec((1, Cr), lambda g: (0, 0)),          # b1
                pl.BlockSpec((Cr, C), lambda g: (0, 0)),          # W2^T (full)
                pl.BlockSpec((1, C), lambda g: (0, 0)),           # b2
            ],
            out_specs=pl.BlockSpec((Bt, C, HWp), lambda g: (g, 0, 0)),
        ),
        compiler_params=pltpu.CompilerParams(
            dimension_semantics=("parallel",),
            vmem_limit_bytes=vmem_limit),
    )(x, w1t, b1r, w2t, b2r)

    return out[:B, :, :HW].reshape(B, C, H, W)


def channel_attention_ref(x, w1, b1, w2, b2):
    """Pure-JAX reference mirroring the PyTorch forward."""
    avg_p = jnp.mean(x, axis=(2, 3))               # (B, C)
    max_p = jnp.max(x, axis=(2, 3))                # (B, C)

    def mlp(p):
        h = jnp.maximum(p @ w1.T + b1, 0.0)
        return h @ w2.T + b2

    att = jax.nn.sigmoid(mlp(avg_p) + mlp(max_p))  # (B, C)
    return x * att[:, :, None, None]


if __name__ == "__main__":
    key = jax.random.PRNGKey(0)
    kx, k1, k2, k3, k4, kx2 = jax.random.split(key, 6)

    # Case 1: channel_in=32, reduction_ratio=16, 16x16 spatial (HW already 128-aligned).
    B, C, H, W = 2, 32, 16, 16
    Cr = C // 16
    x = jax.random.normal(kx, (B, C, H, W), dtype=jnp.float32)
    w1 = jax.random.normal(k1, (Cr, C), dtype=jnp.float32) * 0.1
    b1 = jax.random.normal(k2, (Cr,), dtype=jnp.float32) * 0.1
    w2 = jax.random.normal(k3, (C, Cr), dtype=jnp.float32) * 0.1
    b2 = jax.random.normal(k4, (C,), dtype=jnp.float32) * 0.1

    out = jax.block_until_ready(channel_attention(x, w1, b1, w2, b2))
    ref = channel_attention_ref(x, w1, b1, w2, b2)
    assert out.shape == (B, C, H, W)
    assert jnp.allclose(out, ref, atol=1e-5, rtol=1e-5), "mismatch vs reference (case 1)"

    # Case 2: exercises spatial padding (10x10 -> 128 lanes) and batch padding.
    B2, H2, W2 = 3, 10, 10
    x2 = jax.random.normal(kx2, (B2, C, H2, W2), dtype=jnp.float32)
    out2 = jax.block_until_ready(channel_attention(x2, w1, b1, w2, b2))
    ref2 = channel_attention_ref(x2, w1, b1, w2, b2)
    assert out2.shape == (B2, C, H2, W2)
    assert jnp.allclose(out2, ref2, atol=1e-5, rtol=1e-5), "mismatch vs reference (case 2)"

    print("KERNEL_OK")
</pallas_src>

<mosaic_0001>
module attributes {stable_mosaic.version = 11 : i64} {
  func.func @_channel_attention_kernel(%arg0: i32, %arg1: memref<1x32x256xf32, #tpu.memory_space<vmem>>, %arg2: memref<32x2xf32, #tpu.memory_space<vmem>>, %arg3: memref<1x2xf32, #tpu.memory_space<vmem>>, %arg4: memref<2x32xf32, #tpu.memory_space<vmem>>, %arg5: memref<1x32xf32, #tpu.memory_space<vmem>>, %arg6: memref<1x32x256xf32, #tpu.memory_space<vmem>>) attributes {dimension_semantics = [#tpu.dimension_semantics<parallel>], iteration_bounds = array<i64: 2>, scalar_prefetch = 0 : i64, scratch_operands = 0 : i64, tpu.core_type = #tpu.core_type<tc>, window_params = [{transform_indices = @transform_0, window_bounds = array<i64: 1, 32, 256>}, {pipeline_mode = #tpu.pipeline_mode<synchronous>, transform_indices = @transform_1, window_bounds = array<i64: 32, 2>}, {pipeline_mode = #tpu.pipeline_mode<synchronous>, transform_indices = @transform_2, window_bounds = array<i64: 1, 2>}, {pipeline_mode = #tpu.pipeline_mode<synchronous>, transform_indices = @transform_3, window_bounds = array<i64: 2, 32>}, {pipeline_mode = #tpu.pipeline_mode<synchronous>, transform_indices = @transform_4, window_bounds = array<i64: 1, 32>}, {transform_indices = @transform_5, window_bounds = array<i64: 1, 32, 256>}]} {
    %c0 = arith.constant 0 : index
    %c0_0 = arith.constant 0 : index
    %c0_1 = arith.constant 0 : index
    %0 = vector.load %arg1[%c0, %c0_0, %c0_1] : memref<1x32x256xf32, #tpu.memory_space<vmem>>, vector<1x32x256xf32>
    %cst = arith.constant dense<0.000000e+00> : vector<1x32xf32>
    %1 = vector.multi_reduction <add>, %0, %cst [2] : vector<1x32x256xf32> to vector<1x32xf32>
    %cst_2 = arith.constant 3.906250e-03 : f32
    %2 = vector.broadcast %cst_2 : f32 to vector<1x32xf32>
    %3 = arith.mulf %1, %2 : vector<1x32xf32>
    %cst_3 = arith.constant dense<0xFF800000> : vector<1x32xf32>
    %4 = vector.multi_reduction <maximumf>, %0, %cst_3 [2] : vector<1x32x256xf32> to vector<1x32xf32>
    %5 = tpu.concatenate %3, %4 in 0 : vector<1x32xf32>, vector<1x32xf32> -> vector<2x32xf32>
    %c0_4 = arith.constant 0 : index
    %c0_5 = arith.constant 0 : index
    %6 = vector.load %arg2[%c0_4, %c0_5] : memref<32x2xf32, #tpu.memory_space<vmem>>, vector<32x2xf32>
    %cst_6 = arith.constant dense<0.000000e+00> : vector<2x2xf32>
    %7 = tpu.matmul %5, %6, %cst_6 {dimension_numbers = #tpu.dot_dimension_numbers<[1], [0], [0], [1], [0, 0, 1, 1], [], []>} : vector<2x32xf32>, vector<32x2xf32>, vector<2x2xf32> -> vector<2x2xf32>
    %c0_7 = arith.constant 0 : index
    %c0_8 = arith.constant 0 : index
    %8 = vector.load %arg3[%c0_7, %c0_8] : memref<1x2xf32, #tpu.memory_space<vmem>>, vector<1x2xf32>
    %9 = vector.broadcast %8 : vector<1x2xf32> to vector<2x2xf32>
    %10 = arith.addf %7, %9 : vector<2x2xf32>
    %cst_9 = arith.constant 0.000000e+00 : f32
    %11 = vector.broadcast %cst_9 : f32 to vector<2x2xf32>
    %12 = arith.maximumf %10, %11 : vector<2x2xf32>
    %c0_10 = arith.constant 0 : index
    %c0_11 = arith.constant 0 : index
    %13 = vector.load %arg4[%c0_10, %c0_11] : memref<2x32xf32, #tpu.memory_space<vmem>>, vector<2x32xf32>
    %cst_12 = arith.constant dense<0.000000e+00> : vector<2x32xf32>
    %14 = tpu.matmul %12, %13, %cst_12 {dimension_numbers = #tpu.dot_dimension_numbers<[1], [0], [0], [1], [0, 0, 1, 1], [], []>} : vector<2x2xf32>, vector<2x32xf32>, vector<2x32xf32> -> vector<2x32xf32>
    %c0_13 = arith.constant 0 : index
    %c0_14 = arith.constant 0 : index
    %15 = vector.load %arg5[%c0_13, %c0_14] : memref<1x32xf32, #tpu.memory_space<vmem>>, vector<1x32xf32>
    %16 = vector.broadcast %15 : vector<1x32xf32> to vector<2x32xf32>
    %17 = arith.addf %14, %16 : vector<2x32xf32>
    %18 = vector.extract_strided_slice %17 {offsets = [0, 0], sizes = [1, 32], strides = [1, 1]} : vector<2x32xf32> to vector<1x32xf32>
    %19 = vector.extract_strided_slice %17 {offsets = [1, 0], sizes = [1, 32], strides = [1, 1]} : vector<2x32xf32> to vector<1x32xf32>
    %20 = arith.addf %18, %19 : vector<1x32xf32>
    %21 = arith.negf %20 : vector<1x32xf32>
    %22 = math.exp %21 : vector<1x32xf32>
    %cst_15 = arith.constant 1.000000e+00 : f32
    %23 = vector.broadcast %cst_15 : f32 to vector<1x32xf32>
    %24 = arith.addf %23, %22 : vector<1x32xf32>
    %25 = arith.divf %23, %24 : vector<1x32xf32>
    %26 = vector.shape_cast %25 : vector<1x32xf32> to vector<1x32x1xf32>
    %27 = vector.broadcast %26 : vector<1x32x1xf32> to vector<1x32x256xf32>
    %28 = arith.mulf %0, %27 : vector<1x32x256xf32>
    %c0_16 = arith.constant 0 : index
    %c0_17 = arith.constant 0 : index
    %c0_18 = arith.constant 0 : index
    %29 = vector.load %arg6[%c0_16, %c0_17, %c0_18] : memref<1x32x256xf32, #tpu.memory_space<vmem>>, vector<1x32x256xf32>
    tpu.vector_store %arg6[%c0_16, %c0_17, %c0_18], %28 {strides = array<i32>} : memref<1x32x256xf32, #tpu.memory_space<vmem>>, vector<1x32x256xf32>,
    return
  }
  func.func @transform_0(%arg0: i32) -> (i32, i32, i32) {
    %c0_i32 = arith.constant 0 : i32
    %c0_i32_0 = arith.constant 0 : i32
    %c0_i32_1 = arith.constant 0 : i32
    return %arg0, %c0_i32, %c0_i32_0 : i32, i32, i32
  }
  func.func @transform_1(%arg0: i32) -> (i32, i32) {
    %c0_i32 = arith.constant 0 : i32
    %c0_i32_0 = arith.constant 0 : i32
    %c0_i32_1 = arith.constant 0 : i32
    return %c0_i32, %c0_i32_0 : i32, i32
  }
  func.func @transform_2(%arg0: i32) -> (i32, i32) {
    %c0_i32 = arith.constant 0 : i32
    %c0_i32_0 = arith.constant 0 : i32
    %c0_i32_1 = arith.constant 0 : i32
    return %c0_i32, %c0_i32_0 : i32, i32
  }
  func.func @transform_3(%arg0: i32) -> (i32, i32) {
    %c0_i32 = arith.constant 0 : i32
    %c0_i32_0 = arith.constant 0 : i32
    %c0_i32_1 = arith.constant 0 : i32
    return %c0_i32, %c0_i32_0 : i32, i32
  }
  func.func @transform_4(%arg0: i32) -> (i32, i32) {
    %c0_i32 = arith.constant 0 : i32
    %c0_i32_0 = arith.constant 0 : i32
    %c0_i32_1 = arith.constant 0 : i32
    return %c0_i32, %c0_i32_0 : i32, i32
  }
  func.func @transform_5(%arg0: i32) -> (i32, i32, i32) {
    %c0_i32 = arith.constant 0 : i32
    %c0_i32_0 = arith.constant 0 : i32
    %c0_i32_1 = arith.constant 0 : i32
    return %arg0, %c0_i32, %c0_i32_0 : i32, i32, i32
  }
}

</mosaic_0001>

<bundles_post_ra>
// kernel: tpu_custom_call.1
= control target key start
LH: loop header
LB: loop body
LE: loop exit
PB: predicated region body
PF: predicated region fallthrough
CT: control target
= control target key end

     0   :  { %10 = vsyncpa [#allocation3], 0  ;;  %s1102_s0 = inlined_call_operand.hbm [shape: f32[2,32,256], index: 0, kind: input, shape index: {}]   ;;  %s1103_s1 = inlined_call_operand.vmem [shape: f32[32,2], index: 1, kind: input, shape index: {}]   ;;  %s1104_s2 = inlined_call_operand.vmem [shape: f32[1,2], index: 2, kind: input, shape index: {}]   ;;  %s1105_s3 = inlined_call_operand.vmem [shape: f32[2,32], index: 3, kind: input, shape index: {}]   ;;  %s1106_s4 = inlined_call_operand.vmem [shape: f32[1,32], index: 4, kind: input, shape index: {}]   ;;  %s1107_s5 = inlined_call_operand.hbm [shape: f32[2,32,256], index: 5, kind: output, shape index: {}]  }
   0x1   :  { %12 = vsyncpa [#allocation3 + $0x1], 0 }
   0x2   :  { %13 = vsyncpa [#allocation4], 0 }
   0x3   :  { %15 = vsyncpa [#allocation4 + $0x1], 0  ;;  %s874_s18 = smov 0   ;;  %s876_s19 = smov 0  }
   0x4   :  { %s878_s20 = smov 0   ;;  %s880_s21 = smov 0  }
   0x5 LB: > { %s895_s22 = sadd.s32 4294967295, %s834_s21   ;;  %s641_s23 = sadd.s32 4294967294, %s834_s21   ;;  %s834_s21 = sphi %s880_s21, %s1122_s21   ;;  %s830_s20 = sphi %s878_s20, %s1121_s20   ;;  %s826_s19 = sphi %s876_s19, %s1120_s19   ;;  %s822_s18 = sphi %s874_s18, %s1119_s18  }
   0x6   : > { %s899_s24 = sadd.s32 1, %s834_s21   ;;  %s28_s25 = sadd.s32 1, %s830_s20 }
   0x7   : > { %s25_s26 = ssub.s32 %s834_s21, %s899_s24  ;;  %p35_p0 = scmp.ne.s32.totalorder %s830_s20, %s826_s19 }
   0x8   : > { %p26_p1 = scmp.eq.s32.totalorder %s25_s26, 0  ;;  %p36_p2 = scmp.eq.s32.totalorder %s834_s21, 0 }
   0x9   : > { %p41_p3 = scmp.ne.s32.totalorder %s826_s19, %s822_s18  ;;  %p42_p4 = scmp.eq.s32.totalorder %s895_s22, 0 }
   0xa   : > { %s911_s27 = scalar_select %p26_p1, %s830_s20, %s28_s25  }
   0xb   : > { %p913_p5 = por %p36_p2, %p35_p0  ;;  %p917_p6 = por %p42_p4, %p41_p3 }
   0xc   : > { %p149_p7 = scmp.eq.s32.totalorder %s895_s22, 1  ;;  %p155_p8 = scmp.eq.s32.totalorder %s641_s23, 1 }
   0xd   : > { %s1111_s29 = scalar_select %p917_p6, 1, 0 }
   0xe   : > { %p698_p10 = scmp.lt.s32.totalorder %s834_s21, 2  ;;  %p924_p11 = por %p149_p7, %p35_p0 }
   0xf   : > { %p928_p12 = por %p155_p8, %p41_p3  ;;  %s187_s7 = sand.u32 1, %s830_s20  }
  0x10   : > { %s1112_s30 = scalar_select %p924_p11, 1, 0 }
  0x11   : > { %s1113_s6 = scalar_select %p928_p12, 1, 0 }
  0x12   : > { %s661_s8 = sshll.u32 %s834_s21, 10  ;;  %s644_s9 = sshll.u32 %s187_s7, 6 }
  0x13   : > { %s937_s12 = scalar_lea.hbm %s1102_s0, %s661_s8  ;;  %s191_s13 = scalar_lea.vmem [#allocation2], %s644_s9 }
  0x14   : > { %s198_s14 = sshll.u32 %s191_s13, 4  ;;  %p941_p13 = pnand %p698_p10, %p913_p5  ;;  %s945_s14 = int_to_ptr.vmem [resolvable:$true] %s198_s14 }
  0x15   : > { %s947_s16 = scalar_lea.sflag [#allocation3], %s187_s7  ;;  %s742_s17 = scalar_lea.hbm %s937_s12, 1024 }
  0x16   : > { %p743_p0 = scmp.ne.s32.totalorder %s937_s12, %s742_s17  ;;  %p744_p1 = pneg %p941_p13 }
  0x17   : > { %s747_s26 = scalar_lea.hbm %s1102_s0, 2048  ;;  %p748_p4 = scmp.lt.s32.totalorder %s937_s12, %s1102_s0 }
  0x18   : > { %p745_p2 = pnand %p744_p1, %p743_p0  ;;  %p749_p5 = scmp.lt.s32.totalorder %s747_s26, %s742_s17 }
  0x1a   : > { %p746_p3 = pneg %p745_p2  ;;  %p750_p7 = por %p749_p5, %p748_p4 }
  0x1c   : > { %p751_p8 = pnand %p750_p7, %p746_p3 }
  0x1e   : > { %754 = shalt.err (!%p751_p8)
}
  0x1f   : > { %s755_s7 = scalar_lea.vmem %s945_s14, 1024  ;;  %s836_s9 = smov [#allocation2]  }
  0x20   : > { %p756_p10 = scmp.ne.s32.totalorder %s945_s14, %s755_s7  ;;  %s760_s10 = sshll.u32 %s836_s9, 4  ;;  %s761_s10 = int_to_ptr.vmem [resolvable:$false] %s760_s10 }
  0x21   : > { %s762_s11 = scalar_lea.vmem %s761_s10, 2048  ;;  %p763_p2 = scmp.lt.s32.totalorder %s945_s14, %s761_s10 }
  0x22   : > { %p758_p9 = pnand %p756_p10, %p744_p1  ;;  %p764_p12 = scmp.lt.s32.totalorder %s762_s11, %s755_s7 }
  0x24   : > { %p759_p0 = pneg %p758_p9  ;;  %p765_p11 = por %p764_p12, %p763_p2 }
  0x26   : > { %p766_p6 = pnand %p765_p11, %p759_p0 }
  0x28   : > { %769 = shalt.err (!%p766_p6)
}
  0x29   : > { %s837_s13 = smov 256   ;;  %s838_s17 = smov 16  }
  0x2a   : > { %693 = dma.hbm_to_vmem [thread:$0]  (!%p941_p13), %s937_s12, 1024, %s945_s14, %s947_s16, %s837_s13, %s837_s13, %s838_s17  }
  0x2b   : > { %p647_p9 = scmp.ge.s32.totalorder %s834_s21, 1  ;;  %p206_p1 = scmp.lt.s32.totalorder %s834_s21, 3 }
  0x2d   : > { %p207_p3 = pnand %p647_p9, %p206_p1 }
  0x2e   : > { %s971_s23 = sand.u32 (!%p207_p3), 1, %s826_s19   ;;  %p1115_p6 = scmp.ne.s32.totalorder (!%p207_p3), %s1111_s29, 0 }
  0x2f   : > { %210 = sbr.rel (%p207_p3) target bundleno = 781 (0x30d), region = 40  ;;  %s648_s25 = sshll.u32 (!%p207_p3), %s971_s23, 6 }
  0x30   : > { %s213_s26 = scalar_lea.sflag (!%p207_p3), [#allocation3], %s971_s23  ;;  %s216_s28 = scalar_lea.vmem (!%p207_p3), [#allocation2], %s648_s25 }
  0x34   : > { %813 = dma.done.wait (%p1115_p6), %s213_s26, 1024  }
  0x35   : > { %815 = vsyncadd (%p1115_p6), %s213_s26, 4294966272  ;;  %v981_v0 = vld [vmem:[%s216_s28 + $0x20] sm:$0xff]  ;;  %v983_v1 = vld [vmem:[%s216_s28 + $0x28] sm:$0xff]  ;;  %v839_v16 = vmov 0.0   ;;  %vm840_vm0 = vmmov 0   ;;  %v283_v21 = vlaneseq  ;;  %vm294_vm1 = vcmask 130112  }
  0x36   : > { %v985_v2 = vld [vmem:[%s216_s28] sm:$0xff]  ;;  %v257_v3 = vadd.f32 %v983_v1, %v981_v0  ;;  %v989_v4 = vld [vmem:[%s216_s28 + $0x8] sm:$0xff]  ;;  %v991_v5 = vld [vmem:[%s216_s28 + $0x30] sm:$0xff]  ;;  %v273_v15 = vmax.f32 %v981_v0, %v983_v1  ;;  %670 = vmatprep.subr.mxu0 %v839_v16  ;;  %681 = vmatprep.subr.mxu1 %v839_v16  ;;  %vm301_vm2 = vcmask 195712   ;;  %vm308_vm3 = vcmask 261312   ;;  %s242_s29 = scalar_lea.vmem [#allocation5], %s648_s25 }
  0x37   : > { %v993_v6 = vld [vmem:[%s216_s28 + $0x38] sm:$0xff]  ;;  %v251_v7 = vadd.f32 %v989_v4, %v985_v2  ;;  %v997_v8 = vld [vmem:[%s216_s28 + $0x10] sm:$0xff]  ;;  %v267_v13 = vmax.f32 %v985_v2, %v989_v4  ;;  %v338_v19 = vld [vmem:[%s1103_s1 + $0x8] sm:$0xff]  ;;  %678 = vmatprep.mubr.msk.f32.mxu0 %vm840_vm0, %v839_v16  ;;  %683 = vmatprep.mubr.msk.f32.mxu1 %vm840_vm0, %v839_v16  ;;  %v284_v22 = vand.u32 127, %v283_v21  ;;  %v1025_v25 = vshrl.u32 %v283_v21, 7  ;;  %s568_s12 = sshll.u32 %s242_s29, 4  ;;  %s1052_s12 = int_to_ptr.vmem [resolvable:$true] %s568_s12 }
  0x38   : > { %v999_v9 = vld [vmem:[%s216_s28 + $0x18] sm:$0xff]  ;;  %258 = vadd.xlane.f32.xlu1 %v257_v3  ;;  %v260_v10 = vadd.f32 %v993_v6, %v991_v5  ;;  %v276_v14 = vmax.f32 %v991_v5, %v993_v6  ;;  %v339_v18 = vld [vmem:[%s1103_s1 + $0x10] sm:$0xff]  ;;  %v337_v20 = vld [vmem:[%s1103_s1] sm:$0xff]  ;;  %vm335_vm4 = vcmask 1040384   ;;  %vm348_vm5 = vcmask 261120   ;;  %s662_s14 = sshll.u32 %s895_s22, 10 }
  0x39   : > { %252 = vadd.xlane.f32.xlu0 %v251_v7  ;;  %v254_v11 = vadd.f32 %v999_v9, %v997_v8  ;;  %v270_v12 = vmax.f32 %v997_v8, %v999_v9  ;;  %v340_v17 = vld [vmem:[%s1103_s1 + $0x18] sm:$0xff]  ;;  %v289_v24 = vadd.s32 4294967288, %v284_v22  ;;  %v296_v27 = vadd.s32 4294967280, %v284_v22  ;;  %v423_v58 = vld [vmem:[%s1105_s3] sm:$0x3]  ;;  %s1057_s16 = scalar_lea.hbm %s1107_s5, %s662_s14  ;;  %s555_s22 = scalar_lea.sflag [#allocation4], %s971_s23 }
  0x3a   : > { %671 = vmatpush3.msra.mxu0 %v340_v17  ;;  %v287_v30 = vsub.s32 %v284_v22, %v1025_v25  ;;  %v303_v32 = vadd.s32 4294967272, %v284_v22  ;;  %vm435_vm6 = vcmask 1041408   ;;  %v650_v59 = vld [vmem:[%s1104_s2] ss:$0 sm:$0xff]  ;;  %vm431_vm7 = vcmask 15360   ;;  %s770_s8 = scalar_lea.vmem %s1052_s12, 1024 }
  0x3b   : > { %672 = vmatprep.subr.mxu0 %v839_v16  ;;  %v292_v29 = vsub.s32 %v289_v24, %v1025_v25  ;;  %v299_v35 = vsub.s32 %v296_v27, %v1025_v25  ;;  %682 = vmatpush3.msk.msra.mxu1 %vm435_vm6, %v423_v58  ;;  %v652_v3 = vld [vmem:[%s1106_s4] ss:$0 sm:$0xff]  ;;  %v521_v17 = vsub.s32 0, %v1025_v25  ;;  %p771_p11 = scmp.ne.s32.totalorder %s1052_s12, %s770_s8  ;;  %p1116_p12 = scmp.ne.s32.totalorder %s1112_s30, 0 }
  0x3c   : > { %261 = vadd.xlane.f32.xlu1 %v260_v10  ;;  %673 = vmatpush3.msra.mxu0 %v339_v18  ;;  %v306_v40 = vsub.s32 %v303_v32, %v1025_v25  ;;  %s841_s7 = smov [#allocation5]  }
  0x3d   : > { %255 = vadd.xlane.f32.xlu0 %v254_v11  ;;  %674 = vmatprep.subr.mxu0 %v839_v16  ;;  %p772_p13 = pnand %p771_p11, %p1116_p12  ;;  %s774_s9 = sshll.u32 %s841_s7, 4  ;;  %s775_s9 = int_to_ptr.vmem [resolvable:$false] %s774_s9 }
  0x3e   : > { %675 = vmatpush3.msra.mxu0 %v338_v19  ;;  %s776_s10 = scalar_lea.vmem %s775_s9, 2048  ;;  %p777_p5 = scmp.lt.s32.totalorder %s1052_s12, %s775_s9 }
  0x3f   : > { %676 = vmatprep.subr.mxu0 %v839_v16  ;;  %p773_p4 = pneg %p772_p13  ;;  %p778_p7 = scmp.lt.s32.totalorder %s776_s10, %s770_s8 }
  0x40   : > { %271 = vmax.xlane.f32.xlu1 %v270_v12  ;;  %677 = vmatpush3.msra.mxu0 %v337_v20 }
  0x41   : > { %268 = vmax.xlane.f32.xlu0 %v267_v13  ;;  %p779_p8 = por %p778_p7, %p777_p5 }
  0x43   : > { %p780_p10 = pnand %p779_p8, %p773_p4 }
  0x44   : > { %277 = vmax.xlane.f32.xlu1 %v276_v14 }
  0x45   : > { %274 = vmax.xlane.f32.xlu0 %v273_v15 }
  0xc1   : > { %v259_v23 = vpop.xlane.xlu1 %258 }
  0xc2   : > { %v253_v26 = vpop.xlane.xlu0 %252  ;;  %v265_v36 = vmul.f32 0.00390625, %v259_v23 }
  0xc3   : > { %v263_v31 = vmul.f32 0.00390625, %v253_v26 }
  0xc4   : > { %v300_v46 = vrot.slane %v265_v36, %v299_v35 }
  0xc5   : > { %v262_v28 = vpop.xlane.xlu1 %261  ;;  %v288_v39 = vrot.slane %v263_v31, %v287_v30 }
  0xc6   : > { %v256_v33 = vpop.xlane.xlu0 %255  ;;  %v266_v41 = vmul.f32 0.00390625, %v262_v28 }
  0xc7   : > { %v264_v34 = vmul.f32 0.00390625, %v256_v33 }
  0xc8   : > { %v307_v48 = vrot.slane %v266_v41, %v306_v40 }
  0xc9   : > { %v293_v37 = vrot.slane %v264_v34, %v292_v29  ;;  %v272_v38 = vpop.xlane.xlu1 %271 }
  0xca   : > { %v269_v42 = vpop.xlane.xlu0 %268  ;;  %v322_v44 = vrot.slane %v272_v38, %v292_v29 }
  0xcb   : > { %v295_v43 = vsel %vm294_vm1, %v293_v37, %v288_v39  ;;  %v318_v45 = vrot.slane %v269_v42, %v287_v30 }
  0xcc   : > { %v302_v52 = vsel %vm301_vm2, %v300_v46, %v295_v43 }
  0xcd   : > { %v278_v47 = vpop.xlane.xlu1 %277  ;;  %v323_v53 = vsel %vm294_vm1, %v322_v44, %v318_v45  ;;  %v309_v56 = vsel %vm308_vm3, %v307_v48, %v302_v52 }
  0xce   : > { %v275_v49 = vpop.xlane.xlu0 %274  ;;  %v332_v50 = vrot.slane %v278_v47, %v306_v40 }
  0xcf   : > { %v327_v51 = vrot.slane %v275_v49, %v299_v35 }
  0xd1   : > { %v328_v54 = vsel %vm301_vm2, %v327_v51, %v323_v53 }
  0xd2   : > { %v333_v55 = vsel %vm308_vm3, %v332_v50, %v328_v54 }
  0xd3   : > { %v336_v57 = vsel %vm335_vm4, %v309_v56, %v333_v55 }
  0xd4   : > { %679 = vmatmul.mubr.msk.f32.vlgmr.msra.gmra.mxu0 %vm348_vm5, %v336_v57 }
 0x194   : > { %v418_v60 = vpop.f32.mrf.mxu0 }
 0x195   : > { %v419_v61 = vadd.f32 %v650_v59, %v418_v60 }
 0x196   : > { %v680_v62 = vpop.f32.mrf.mxu0 }
 0x197   : > { %v422_v63 = vmax.f32 %v419_v61, 0.0 }
 0x199   : > { %684 = vmatmul.mubr.msk.f32.vlgmr.msra.gmra.mxu1 %vm431_vm7, %v422_v63 }
 0x259   : > { %v505_v7 = vpop.f32.mrf.mxu1 }
 0x25a   : > { %v506_v10 = vadd.f32 %v652_v3, %v505_v7 }
 0x25b   : > { %v685_v11 = vpop.f32.mrf.mxu1 }
 0x25c   : > { %v510_v12 = vrot.slane %v506_v10, 1 }
 0x25e   : > { %v512_v13 = vadd.f32 %v510_v12, %v506_v10 }
 0x260   : > { %v655_v14 = vmul.f32 -1.442695, %v512_v13 }
 0x262   : > { %738 = vpow2.f32 %v655_v14 }
 0x26f   : > { %v739_v15 = vpop.eup %738 }
 0x270   : > { %v516_v16 = vadd.f32 1.0, %v739_v15 }
 0x272   : > { %740 = vrcp.f32 %v516_v16 }
 0x27f   : > { %v741_v18 = vpop.eup %740 }
 0x280   : > { %v522_v19 = vrot.slane %v741_v18, %v521_v17 }
 0x282   : > { %528 = vbcast.lane.b32.xlu1 %v522_v19, 264  ;;  %524 = vbcast.lane.b32.xlu0 %v522_v19, 256 }
 0x286   : > { %532 = vbcast.lane.b32.xlu1 %v522_v19, 272 }
 0x28a   : > { %536 = vbcast.lane.b32.xlu1 %v522_v19, 280 }
 0x2f4   : > { %v529_v20 = vpop.permute.xlu1 %528  ;;  %v525_v21 = vpop.permute.xlu0 %524 }
 0x2f5   : > { %v540_v22 = vmul.f32 %v529_v20, %v997_v8  ;;  %v541_v23 = vmul.f32 %v529_v20, %v999_v9  ;;  %v538_v24 = vmul.f32 %v525_v21, %v985_v2  ;;  %v539_v26 = vmul.f32 %v525_v21, %v989_v4 }
 0x2f7   : > { %548 = vst [vmem:[%s242_s29 + $0x10] sm:$0xff] %v540_v22  ;;  %549 = vst [vmem:[%s242_s29 + $0x18] sm:$0xff] %v541_v23 }
 0x2f8   : > { %546 = vst [vmem:[%s242_s29] sm:$0xff] %v538_v24  ;;  %547 = vst [vmem:[%s242_s29 + $0x8] sm:$0xff] %v539_v26  ;;  %v533_v25 = vpop.permute.xlu1 %532 }
 0x2f9   : > { %v542_v27 = vmul.f32 %v533_v25, %v981_v0  ;;  %v543_v8 = vmul.f32 %v533_v25, %v983_v1 }
 0x2fb   : > { %550 = vst [vmem:[%s242_s29 + $0x20] sm:$0xff] %v542_v27  ;;  %551 = vst [vmem:[%s242_s29 + $0x28] sm:$0xff] %v543_v8 }
 0x2fc   : > { %v537_v2 = vpop.permute.xlu1 %536 }
 0x2fd   : > { %v544_v4 = vmul.f32 %v537_v2, %v991_v5  ;;  %v545_v0 = vmul.f32 %v537_v2, %v993_v6 }
 0x2ff   : > { %552 = vst [vmem:[%s242_s29 + $0x30] sm:$0xff] %v544_v4  ;;  %553 = vst [vmem:[%s242_s29 + $0x38] sm:$0xff] %v545_v0 }
 0x300   : > { %783 = shalt.err (!%p780_p10)
}
 0x301   : > { %s784_s11 = scalar_lea.hbm %s1057_s16, 1024  ;;  %s788_s26 = scalar_lea.hbm %s1107_s5, 2048 }
 0x302   : > { %p785_p0 = scmp.ne.s32.totalorder %s1057_s16, %s784_s11  ;;  %p789_p1 = scmp.lt.s32.totalorder %s1057_s16, %s1107_s5 }
 0x303   : > { %p790_p3 = scmp.lt.s32.totalorder %s788_s26, %s784_s11 }
 0x304   : > { %p786_p2 = pnand %p785_p0, %p1116_p12 }
 0x305   : > { %p791_p6 = por %p790_p3, %p789_p1 }
 0x306   : > { %p787_p9 = pneg %p786_p2 }
 0x308   : > { %p792_p11 = pnand %p791_p6, %p787_p9 }
 0x30a   : > { %795 = shalt.err (!%p792_p11)
}
 0x30b   : > { %s842_s14 = smov 256   ;;  %s843_s25 = smov 16  }
 0x30c   : > { %688 = dma.vmem_to_hbm [thread:$0]  (%p1116_p12), %s1052_s12, 1024, %s1057_s16, %s555_s22, %s842_s14, %s842_s14, %s843_s25  }
 0x30d PF: > { %s583_s15 = sand.u32 1, %s822_s18   ;;  %p1117_p13 = scmp.ne.s32.totalorder %s1113_s6, 0 }
 0x30e   : > { %p1118_p4 = scmp.ge.s32.totalorder %s834_s21, 2  ;;  %s584_s8 = scalar_lea.sflag [#allocation4], %s583_s15 }
 0x310   : > { %p695_p5 = pnand %p1118_p4, %p1117_p13 }
 0x312   : > { %p696_p7 = pneg %p695_p5 }
 0x314   : > { %817 = dma.done.wait (%p696_p7), %s584_s8, 1024  }
 0x315   : > { %819 = vsyncadd (%p696_p7), %s584_s8, 4294966272  ;;  %p18_p8 = scmp.ge.s32.totalorder %s899_s24, 4   ;;  %s1119_s18 = smov %s826_s19 }
 0x316   : > { %s1120_s19 = smov %s830_s20  ;;  %s1121_s20 = smov %s911_s27 }
 0x317   : > { %s1122_s21 = smov %s899_s24  ;;  %20 = sbr.rel (!%p18_p8) target bundleno = 5 (0x5), region = 85 }
 0x31c   :  { %589 = vsyncpa [#allocation3], 1 }
 0x31d   :  { %591 = vsyncpa [#allocation3 + $0x1], 1 }
 0x31e   :  { %592 = vsyncpa [#allocation4], 1 }
 0x31f   :  { %594 = vsyncpa [#allocation4 + $0x1], 1 }

</bundles_post_ra>
